<compile_context>
chip_gen: v7x
topology: tpu7x:2x2x1
jax: 0.10.0
libtpu: 0.0.40
codegen_flags: <defaults>
</compile_context>

<pallas_src>
import jax
import jax.numpy as jnp
from jax.experimental import pallas as pl
from jax.experimental.pallas import tpu as pltpu


# ---------------------------------------------------------------------------
# PE buffer (matches the PyTorch __init__)
# ---------------------------------------------------------------------------
def _build_pe_table(d_model: int, max_len: int = 50) -> jnp.ndarray:
    """Sinusoidal positional-encoding buffer, shape (1, max_len, d_model), f32."""
    position = jnp.arange(0, max_len, dtype=jnp.float32)[:, None]           # (max_len, 1)
    div_term = jnp.exp(
        jnp.arange(0, d_model, 2, dtype=jnp.float32)
        * -(jnp.log(jnp.float32(10000.0)) / d_model)
    )                                                                         # (ceil(d/2),)
    angles = position * div_term                                              # (max_len, ceil(d/2))
    pe = jnp.zeros((max_len, d_model), dtype=jnp.float32)
    pe = pe.at[:, 0::2].set(jnp.sin(angles))
    pe = pe.at[:, 1::2].set(jnp.cos(angles)[:, : d_model // 2])               # odd-d_model safe
    return pe[None, :, :]                                                     # (1, max_len, d_model)


# ---------------------------------------------------------------------------
# Kernel
# ---------------------------------------------------------------------------
def _pos_enc_kernel(x_ref, pe_ref, o_ref):
    # x_ref / o_ref: (bB, bk, bc) activation tile.
    # pe_ref:        (1,  bk, bc) f32 positional tile -> broadcasts over batch.
    # Add in f32 (matches the PyTorch f32 buffer), downcast once to out dtype.
    o_ref[...] = (x_ref[...].astype(jnp.float32) + pe_ref[...]).astype(o_ref.dtype)


# ---------------------------------------------------------------------------
# Tiling helpers
# ---------------------------------------------------------------------------
def _divisors(n: int):
    ds = set()
    i = 1
    while i * i <= n:
        if n % i == 0:
            ds.add(i)
            ds.add(n // i)
        i += 1
    return sorted(ds)


def _pad_up(n: int, a: int) -> int:
    return ((n + a - 1) // a) * a


def _choose_view(L: int):
    """Split the per-example flat length L = S*D into (K, C).

    C is the lane axis (want a multiple of 128 -> unmasked full-width stores),
    K is the sublane axis (want a multiple of 8 -> zero (8,128) tile padding).
    Preference: 8 | K, then K >= 8, then longer lanes. Falls back to (1, L)
    for ragged shapes (still legal: full-dim block dims are always allowed).
    """
    best = None
    for C in _divisors(L):
        if C % 128 != 0:
            continue
        K = L // C
        score = (K % 8 == 0, K >= 8, C)
        if best is None or score > best[0]:
            best = (score, (K, C))
    if best is None:
        # TODO(synk): L not a multiple of 128 -> single padded row per example;
        # pad S*D up to a multiple of 1024 upstream for such shapes.
        return 1, L
    return best[1]


def _block_dim_aligned(n: int, align: int, cap: int) -> int:
    """Legal block dim for a lane/sublane axis of extent n.

    Valid values: divisors of n that are multiples of `align`, or n itself.
    Returns the largest aligned divisor <= cap; else the smallest aligned
    divisor; else n (full-dim fallback, legal under the (8,128) rule).
    """
    cands = [d for d in _divisors(n) if d % align == 0]
    under = [d for d in cands if d <= cap]
    if under:
        return max(under)
    if cands:
        return min(cands)
    return n


def _block_dim_any(n: int, cap: int) -> int:
    """Largest divisor of n that is <= cap (no alignment constraint)."""
    under = [d for d in _divisors(n) if d <= cap]
    return max(under) if under else n


# ---------------------------------------------------------------------------
# Wrapper (== PositionalEncoding.forward)
# ---------------------------------------------------------------------------
def positional_encoding(x: jnp.ndarray, pe: jnp.ndarray) -> jnp.ndarray:
    """x: (B, S, D); pe: (1, max_len, D) f32. Returns x + pe[:, :S] in x.dtype."""
    B, S, D = x.shape
    L = S * D

    # Re-view the (S, D) plane as (K, C): sublane x lane.
    K, C = _choose_view(L)
    x3 = x.reshape(B, K, C)
    pe3 = pe[:, :S, :].astype(jnp.float32).reshape(1, K, C)   # keep pe in f32

    itemsize = jnp.dtype(x.dtype).itemsize
    target = 4 << 20   # ~4 MiB of x per block (2-4 MiB amortizes the ~0.35us/step overhead)

    # Lane block: multiple of 128, capped so that 8 sublanes of it still fit the target.
    bc = _block_dim_aligned(C, 128, max(128, target // (8 * itemsize)))
    bc_p = _pad_up(bc, 128)
    # Sublane block: multiple of 8, sized so bk * bc fills the byte target.
    bk = _block_dim_aligned(K, 8, max(8, target // (bc_p * itemsize)))
    bk_p = _pad_up(bk, 8)
    # Batch block: fill the remaining byte budget (no alignment constraint on a major dim).
    bB = _block_dim_any(B, max(1, target // (bk_p * bc_p * itemsize)))

    # Safety clamp for ragged fallbacks: never let a forced full-dim block blow
    # past the budget if a smaller legal choice exists (padded-footprint math).
    def _blk_bytes(bB_, bk_, bc_):
        return bB_ * _pad_up(bk_, 8) * _pad_up(bc_, 128) * itemsize

    if _blk_bytes(bB, bk, bc) > target:
        bB = 1
    if _blk_bytes(bB, bk, bc) > target:
        bk = _block_dim_aligned(K, 8, 8)
    if _blk_bytes(bB, bk, bc) > target:
        bc = _block_dim_aligned(C, 128, 128)
    # TODO(synk): a ragged L whose single (1, 1, C) row still exceeds VMEM is not
    # handled here; pad the model dims upstream for such shapes.

    n_k, n_c, n_b = K // bk, C // bc, B // bB

    grid_spec = pltpu.PrefetchScalarGridSpec(
        num_scalar_prefetch=0,
        # Batch innermost: the pe block index is constant across consecutive
        # steps, so the broadcast operand is not re-fetched per batch block.
        grid=(n_k, n_c, n_b),
        in_specs=[
            pl.BlockSpec((bB, bk, bc), lambda kb, cb, b: (b, kb, cb)),   # x tile
            pl.BlockSpec((1, bk, bc), lambda kb, cb, b: (0, kb, cb)),    # pe tile (f32, batch-bcast)
        ],
        out_specs=pl.BlockSpec((bB, bk, bc), lambda kb, cb, b: (b, kb, cb)),
    )

    out3 = pl.pallas_call(
        _pos_enc_kernel,
        out_shape=jax.ShapeDtypeStruct((B, K, C), x.dtype),
        grid_spec=grid_spec,
        input_output_aliases={0: 0},   # in-place add when the caller donates x
        compiler_params=pltpu.CompilerParams(
            dimension_semantics=("parallel", "parallel", "parallel"),
            vmem_limit_bytes=48 << 20,   # explicit: safe on v7x (64 MiB) and v5e/v6e (128 MiB)
        ),
        cost_estimate=pl.CostEstimate(
            flops=B * L,
            transcendentals=0,
            bytes_accessed=2 * B * L * itemsize + L * 4,
        ),
    )(x3, pe3)

    return out3.reshape(B, S, D)


# ---------------------------------------------------------------------------
# Self-test
# ---------------------------------------------------------------------------
if __name__ == "__main__":
    # Small shapes consistent with the module: batch=2, seq=8, d_model=32.
    B, S, D = 2, 8, 32
    max_len = 50

    key = jax.random.PRNGKey(0)
    x = jax.random.normal(key, (B, S, D), dtype=jnp.float32)

    pe = _build_pe_table(D, max_len)

    # Reference computed first (plain JAX), before the (aliased) kernel call.
    ref = x + pe[:, :S, :]

    out = positional_encoding(x, pe)
    out = jax.block_until_ready(out)

    assert out.shape == (B, S, D)
    assert jnp.allclose(out, ref, atol=1e-6), "mismatch vs reference"

    print("KERNEL_OK")
</pallas_src>

<mosaic_0001>
module attributes {stable_mosaic.version = 11 : i64} {
  func.func @_pos_enc_kernel(%arg0: i32, %arg1: i32, %arg2: i32, %arg3: memref<2x1x256xf32, #tpu.memory_space<vmem>>, %arg4: memref<1x1x256xf32, #tpu.memory_space<vmem>>, %arg5: memref<2x1x256xf32, #tpu.memory_space<vmem>>) attributes {dimension_semantics = [#tpu.dimension_semantics<parallel>, #tpu.dimension_semantics<parallel>, #tpu.dimension_semantics<parallel>], iteration_bounds = array<i64: 1, 1, 1>, scalar_prefetch = 0 : i64, scratch_operands = 0 : i64, tpu.core_type = #tpu.core_type<tc>, window_params = [{transform_indices = @transform_0, window_bounds = array<i64: 2, 1, 256>}, {transform_indices = @transform_1, window_bounds = array<i64: 1, 1, 256>}, {transform_indices = @transform_2, window_bounds = array<i64: 2, 1, 256>}]} {
    %c0 = arith.constant 0 : index
    %c0_0 = arith.constant 0 : index
    %c0_1 = arith.constant 0 : index
    %0 = vector.load %arg3[%c0, %c0_0, %c0_1] : memref<2x1x256xf32, #tpu.memory_space<vmem>>, vector<2x1x256xf32>
    %c0_2 = arith.constant 0 : index
    %c0_3 = arith.constant 0 : index
    %c0_4 = arith.constant 0 : index
    %1 = vector.load %arg4[%c0_2, %c0_3, %c0_4] : memref<1x1x256xf32, #tpu.memory_space<vmem>>, vector<1x1x256xf32>
    %2 = vector.broadcast %1 : vector<1x1x256xf32> to vector<2x1x256xf32>
    %3 = arith.addf %0, %2 : vector<2x1x256xf32>
    %c0_5 = arith.constant 0 : index
    %c0_6 = arith.constant 0 : index
    %c0_7 = arith.constant 0 : index
    %4 = vector.load %arg5[%c0_5, %c0_6, %c0_7] : memref<2x1x256xf32, #tpu.memory_space<vmem>>, vector<2x1x256xf32>
    tpu.vector_store %arg5[%c0_5, %c0_6, %c0_7], %3 {strides = array<i32>} : memref<2x1x256xf32, #tpu.memory_space<vmem>>, vector<2x1x256xf32>,
    return
  }
  func.func @transform_0(%arg0: i32, %arg1: i32, %arg2: i32) -> (i32, i32, i32) {
    %c0_i32 = arith.constant 0 : i32
    return %arg2, %arg0, %arg1 : i32, i32, i32
  }
  func.func @transform_1(%arg0: i32, %arg1: i32, %arg2: i32) -> (i32, i32, i32) {
    %c0_i32 = arith.constant 0 : i32
    %c0_i32_0 = arith.constant 0 : i32
    return %c0_i32, %arg0, %arg1 : i32, i32, i32
  }
  func.func @transform_2(%arg0: i32, %arg1: i32, %arg2: i32) -> (i32, i32, i32) {
    %c0_i32 = arith.constant 0 : i32
    return %arg2, %arg0, %arg1 : i32, i32, i32
  }
}

</mosaic_0001>

<bundles_post_ra>
// kernel: tpu_custom_call.1
= control target key start
LH: loop header
LB: loop body
LE: loop exit
PB: predicated region body
PF: predicated region fallthrough
CT: control target
= control target key end

     0   :  { %7 = vsyncpa [#allocation3], 0  ;;  %s158_s0 = inlined_call_operand.hbm [shape: f32[2,1,256], index: 0, kind: input, shape index: {}, may-alias: {0,2}]   ;;  %s159_s1 = inlined_call_operand.vmem [shape: f32[1,1,256], index: 1, kind: input, shape index: {}]   ;;  %s160_s2 = inlined_call_operand.hbm [shape: f32[2,1,256], index: 2, kind: output, shape index: {}, may-alias: {0,2}]  }
   0x1   :  { %8 = vsyncpa [#allocation4], 0  ;;  %s106_s9 = smov [#allocation2]   ;;  %s58_s13 = scalar_lea.hbm %s158_s0, 64 }
   0x2   :  { %s14_s10 = sshll.u32 %s106_s9, 4  ;;  %p59_p0 = scmp.ne.s32.totalorder %s158_s0, %s58_s13  ;;  %s15_s10 = int_to_ptr.vmem [resolvable:$true] %s14_s10 }
   0x3   :  { %p62_p1 = scmp.lt.u32.totalorder %s58_s13, %s158_s0 }
   0x5   :  { %p64_p2 = pnand %p62_p1, %p59_p0 }
   0x7   :  { %67 = shalt.err (!%p64_p2)
}
   0x8   :  { %s68_s18 = scalar_lea.vmem %s15_s10, 64  ;;  %p73_p4 = scmp.lt.s32.totalorder %s15_s10, %s15_s10 }
   0x9   :  { %p69_p3 = scmp.ne.s32.totalorder %s15_s10, %s68_s18  ;;  %p74_p5 = scmp.lt.s32.totalorder %s68_s18, %s68_s18 }
   0xb   :  { %p75_p6 = por %p74_p5, %p73_p4 }
   0xd   :  { %p76_p7 = pnand %p75_p6, %p69_p3 }
   0xf   :  { %79 = shalt.err (!%p76_p7)
}
  0x10   :  { %s107_s19 = smov 32   ;;  %s108_s20 = smov 2  }
  0x11   :  { %20 = dma.hbm_to_vmem [thread:$0]  %s158_s0, 64, %s15_s10, [#allocation3], %s107_s19, %s107_s19, %s108_s20  }
  0x12   :  { %102 = dma.done.wait [#allocation3], 64  }
  0x13   :  { %103 = vsyncadd [#allocation3], 4294967232  ;;  %v31_v0 = vlaneseq  ;;  %s109_s23 = smov [#allocation5]   ;;  %v26_v1 = vld [vmem:[#allocation2] sm:$0x3] }
  0x14   :  { %s42_s24 = sshll.u32 %s109_s23, 4  ;;  %v28_v2 = vld [vmem:[%s159_s1] sm:$0x3]  ;;  %v27_v3 = vld [vmem:[#allocation2 + $0x2] sm:$0x3]  ;;  %s43_s24 = int_to_ptr.vmem [resolvable:$true] %s42_s24 }
  0x15   :  { %vm33_vm0 = vcmp.lt.s32.totalorder %v31_v0, 256  ;;  %v29_v4 = vadd.f32 %v28_v2, %v26_v1  ;;  %v30_v5 = vadd.f32 %v28_v2, %v27_v3  ;;  %s80_s27 = scalar_lea.vmem %s43_s24, 64  ;;  %p85_p9 = scmp.lt.s32.totalorder %s43_s24, %s43_s24 }
  0x16   :  { %p81_p8 = scmp.ne.s32.totalorder %s43_s24, %s80_s27  ;;  %p86_p10 = scmp.lt.s32.totalorder %s80_s27, %s80_s27 }
  0x17   :  { %35 = vst.msk [vmem:[#allocation5] sm:$0x3] %vm33_vm0, %v29_v4  ;;  %36 = vst.msk [vmem:[#allocation5 + $0x2] sm:$0x3] %vm33_vm0, %v30_v5 }
  0x18   :  { %p87_p11 = por %p86_p10, %p85_p9 }
  0x1a   :  { %p88_p12 = pnand %p87_p11, %p81_p8 }
  0x1c   :  { %91 = shalt.err (!%p88_p12)
}
  0x1d   :  { %s92_s29 = scalar_lea.hbm %s160_s2, 64 }
  0x1e   :  { %p93_p13 = scmp.ne.s32.totalorder %s160_s2, %s92_s29  ;;  %p96_p0 = scmp.lt.u32.totalorder %s92_s29, %s160_s2 }
  0x20   :  { %p98_p1 = pnand %p96_p0, %p93_p13 }
  0x22   :  { %101 = shalt.err (!%p98_p1)
}
  0x23   :  { %48 = dma.vmem_to_hbm [thread:$0]  %s43_s24, 64, %s160_s2, [#allocation4], %s107_s19, %s107_s19, %s108_s20  }
  0x24   :  { %104 = dma.done.wait [#allocation4], 64  }
  0x25   :  { %105 = vsyncadd [#allocation4], 4294967232 }
  0x26   :  { %52 = vsyncpa [#allocation3], 1 }
  0x27   :  { %53 = vsyncpa [#allocation4], 1 }

</bundles_post_ra>
